<compile_context>
chip_gen: v6e
topology: v6e:2x2x1
jax: 0.10.0
libtpu: 0.0.40
codegen_flags: <defaults>
</compile_context>

<pallas_src>
import math

import jax
import jax.numpy as jnp
from jax import lax
from jax.experimental import pallas as pl
from jax.experimental.pallas import tpu as pltpu

MAX_TBLK = 512   # max time steps resident per WKV grid step (VMEM-safe on v7x too)


def _round_up(x, m):
    return ((x + m - 1) // m) * m


# ----------------------------------------------------------------------------
# Tiled matmul kernel (bf16 MXU operands, f32 accumulation)
# ----------------------------------------------------------------------------
def _matmul_kernel(a_ref, b_ref, o_ref, acc_ref):
    @pl.when(pl.program_id(2) == 0)
    def _():
        acc_ref[...] = jnp.zeros_like(acc_ref)

    acc_ref[...] += jnp.dot(a_ref[...], b_ref[...],
                            preferred_element_type=jnp.float32)

    @pl.when(pl.program_id(2) == pl.num_programs(2) - 1)
    def _():
        o_ref[...] = acc_ref[...].astype(o_ref.dtype)


def _pick_tile(full, options):
    for t in options:
        if full % t == 0:
            return t
    return 128


def pallas_matmul(a, b, out_dtype=jnp.float32):
    """a @ b with bf16 MXU operands and f32 accumulation (pads to tile multiples)."""
    M, K = a.shape
    K2, N = b.shape
    assert K == K2

    a = a.astype(jnp.bfloat16)
    b = b.astype(jnp.bfloat16)

    tm = 256 if M >= 256 else 128
    Mp = _round_up(M, tm)
    Kp = _round_up(K, 128)
    Np = _round_up(N, 128)
    tk = _pick_tile(Kp, (1024, 512, 256, 128))
    tn = _pick_tile(Np, (512, 256, 128))

    if (Mp, Kp) != (M, K):
        a = jnp.pad(a, ((0, Mp - M), (0, Kp - K)))
    if (Kp, Np) != (K, N):
        b = jnp.pad(b, ((0, Kp - K), (0, Np - N)))

    out = pl.pallas_call(
        _matmul_kernel,
        out_shape=jax.ShapeDtypeStruct((Mp, Np), out_dtype),
        grid_spec=pltpu.PrefetchScalarGridSpec(
            num_scalar_prefetch=0,
            grid=(Mp // tm, Np // tn, Kp // tk),
            in_specs=[pl.BlockSpec((tm, tk), lambda i, j, k: (i, k)),
                      pl.BlockSpec((tk, tn), lambda i, j, k: (k, j))],
            out_specs=pl.BlockSpec((tm, tn), lambda i, j, k: (i, j)),
            scratch_shapes=[pltpu.VMEM((tm, tn), jnp.float32)],
        ),
        compiler_params=pltpu.CompilerParams(
            dimension_semantics=("parallel", "parallel", "arbitrary"),
            vmem_limit_bytes=32 * 1024 * 1024),
    )(a, b)

    if (Mp, Np) != (M, N):
        out = out[:M, :N]
    return out


# ----------------------------------------------------------------------------
# WKV7 chunked-recurrence kernel (port of fw_attn_triton), (B, T, C) layout
# ----------------------------------------------------------------------------
def _mm(a, b):        # f32 a @ b (Neumann chain / decay cumsum)
    return lax.dot_general(a, b, (((1,), (0,)), ((), ())),
                           preferred_element_type=jnp.float32)


def _bdot(a, b):      # a @ b, bf16 MXU operands, f32 accumulation
    return lax.dot_general(a.astype(jnp.bfloat16), b.astype(jnp.bfloat16),
                           (((1,), (0,)), ((), ())),
                           preferred_element_type=jnp.float32)


def _bdot_nt(a, b):   # a @ b.T
    return lax.dot_general(a.astype(jnp.bfloat16), b.astype(jnp.bfloat16),
                           (((1,), (1,)), ((), ())),
                           preferred_element_type=jnp.float32)


def _bdot_tn(a, b):   # a.T @ b
    return lax.dot_general(a.astype(jnp.bfloat16), b.astype(jnp.bfloat16),
                           (((0,), (0,)), ((), ())),
                           preferred_element_type=jnp.float32)


def _make_wkv7_kernel(dt):
    """Build a WKV7 kernel for chunk length dt (Neumann depth derived from dt)."""
    n_dbl = max(1, int(round(math.log2(dt))) - 1)

    def kernel(mask_ref, rk_ref, w_ref, q_ref, k_ref, v_ref, a_ref, b_ref,
               y_ref, state_ref):
        hpb, N, _ = state_ref.shape
        t_blk = y_ref.shape[0]
        n_chunks = t_blk // dt

        @pl.when(pl.program_id(2) == 0)
        def _():
            state_ref[...] = jnp.zeros_like(state_ref)

        # constant (dt, dt) operators — built once per grid step
        row = lax.broadcasted_iota(jnp.int32, (dt, dt), 0)
        col = lax.broadcasted_iota(jnp.int32, (dt, dt), 1)
        mask1 = (row > col).astype(jnp.float32)    # strictly lower
        mask2 = (row >= col).astype(jnp.float32)   # lower incl. diagonal
        eye = (row == col).astype(jnp.float32)

        rk_vec = rk_ref[...]                       # (1, lane) r_k bonus weights (f32)

        def chunk_body(c, states):
            ts = pl.ds(pl.multiple_of(c * dt, dt), dt)
            m = mask_ref[ts, :].astype(jnp.float32)            # (dt, 1)
            sw = w_ref[ts, :].astype(jnp.float32)              # (dt, lane) f32 log-decay

            uq = q_ref[ts, :].astype(jnp.float32)              # unmasked (bonus uses these)
            uk = k_ref[ts, :].astype(jnp.float32)
            uv = v_ref[ts, :].astype(jnp.float32)
            sa = a_ref[ts, :].astype(jnp.float32) * m
            sb = b_ref[ts, :].astype(jnp.float32) * m
            sq = uq * m
            sk = uk * m
            sv = uv * m

            # decay prefix products: 3 exps + 1 approx reciprocal per chunk
            neg = -jnp.exp(sw)                                 # log w  (w = exp(-exp(sw)))
            decay = jnp.exp(neg)                               # w
            cs_excl = _mm(mask1, neg)                          # exclusive cumsum of log w
            non_incl_pref = jnp.exp(cs_excl)                   # cumprod(w) / w
            incl_pref = non_incl_pref * decay                  # cumprod(w)
            inv_incl_pref = pl.reciprocal(incl_pref, approx=True)
            fw = incl_pref[dt - 1:dt, :]                       # (1, lane): prod of all w

            wq = sq * incl_pref
            wa = sa * non_incl_pref
            kwi = sk * inv_incl_pref
            bwi = sb * inv_incl_pref

            # fused bonus term (unmasked streams, as in the PyTorch reference)
            prod = uq * uk * rk_vec                            # (dt, lane)

            y_parts = []
            new_states = []
            for h in range(hpb):
                lo = h * N
                st = states[h]                                 # (N, N) f32
                wq_h = wq[:, lo:lo + N]
                wa_h = wa[:, lo:lo + N]
                kwi_h = kwi[:, lo:lo + N]
                bwi_h = bwi[:, lo:lo + N]
                sv_h = sv[:, lo:lo + N]
                fw_h = fw[:, lo:lo + N]

                ab = _bdot_nt(wa_h, bwi_h) * mask1
                ak = _bdot_nt(wa_h, kwi_h) * mask1

                # exact (I - ab)^{-1} via Neumann doubling (ab strictly lower => nilpotent)
                R = eye + ab
                P = _mm(ab, ab)
                for _ in range(n_dbl - 1):
                    R = R + _mm(R, P)
                    P = _mm(P, P)
                ab_inv = R + _mm(R, P)

                ab_u = _bdot(ak, sv_h) + _bdot_nt(wa_h, st)
                u = _bdot(ab_inv, ab_u)

                qk = _bdot_nt(wq_h, kwi_h) * mask2
                qb = _bdot_nt(wq_h, bwi_h) * mask2

                yy = _bdot(qk, sv_h) + _bdot(qb, u) + _bdot_nt(wq_h, st)

                # bonus: ((r*k*r_k).sum over head channels) * v
                bsum = jnp.sum(prod[:, lo:lo + N], axis=1, keepdims=True)
                yy = yy + bsum * uv[:, lo:lo + N]
                y_parts.append(yy)

                new_states.append(st * fw_h
                                  + _bdot_tn(sv_h, kwi_h * fw_h)
                                  + _bdot_tn(u, bwi_h * fw_h))

            y_tile = y_parts[0] if hpb == 1 else jnp.concatenate(y_parts, axis=1)
            y_ref[ts, :] = y_tile.astype(y_ref.dtype)          # one lane-dense store
            return tuple(new_states)

        init = tuple(state_ref[h] for h in range(hpb))
        finals = lax.fori_loop(0, n_chunks, chunk_body, init,
                               unroll=(2 if dt <= 16 else 1))
        for h in range(hpb):
            state_ref[h] = finals[h]

    return kernel


def _pick_hpb(H, N, B, max_lane):
    """Largest divisor of H giving a valid, VMEM/vreg-safe lane width."""
    divs = [d for d in range(1, H + 1)
            if H % d == 0 and ((d * N) % 128 == 0 or d == H) and d * N <= max_lane]
    if not divs:
        divs = [H]                      # full-channel fallback (block == full dim: valid)
    hpb = divs[-1]
    # v7x megacore guardrail: keep >= 2 iterations on the parallel axes if we
    # can do so without dropping below 128 lanes.
    if B * (H // hpb) < 2:
        smaller = [d for d in divs if d < hpb and d * N >= 128]
        if smaller:
            hpb = smaller[-1]
    return hpb


def rwkv7_attention(r, w, k, v, a, b, head_size, mask=None, r_k=None):
    """Forward of RUN_CUDA_RWKV7g (+ optional fused r_k bonus).

    Inputs (B, T, H*N); output (B, T, H*N) bf16.  If r_k (H, N) is given, the
    per-head bonus ((r*k*r_k).sum(-1) * v) is added inside the kernel using the
    *unmasked* streams, matching the PyTorch reference.
    """
    B, T, HC = w.shape
    N = head_size
    H = HC // N
    assert T % 16 == 0, "sequence length must be a multiple of 16"

    dt = 32 if T % 32 == 0 else 16
    max_lane = 128 if dt >= 32 else 256       # balance lane width vs vreg pressure
    hpb = _pick_hpb(H, N, B, max_lane)
    lane = hpb * N

    # as many dt-chunks per grid step as divide T (bounded so tiles stay small)
    n_chunks = T // dt
    cpb = 1
    for d in range(1, n_chunks + 1):
        if n_chunks % d == 0 and d * dt <= MAX_TBLK:
            cpb = d
    t_blk = cpb * dt

    if mask is None:
        mask = jnp.ones((B, T), jnp.float32)
    mask3 = jnp.asarray(mask, jnp.float32).reshape(B, T, 1)

    if r_k is None:
        rk3 = jnp.zeros((H // hpb, 1, lane), jnp.float32)
    else:
        rk3 = jnp.asarray(r_k, jnp.float32).reshape(H // hpb, 1, lane)

    wt = w.astype(jnp.float32)                               # keep decay stream f32
    qt, kt, vt, at, bt = (x.astype(jnp.bfloat16) for x in (r, k, v, a, b))

    data_spec = pl.BlockSpec((None, t_blk, lane), lambda bi, ci, ti: (bi, ti, ci))
    mask_spec = pl.BlockSpec((None, t_blk, 1), lambda bi, ci, ti: (bi, ti, 0))
    rk_spec = pl.BlockSpec((None, 1, lane), lambda bi, ci, ti: (ci, 0, 0))

    kernel = _make_wkv7_kernel(dt)

    y = pl.pallas_call(
        kernel,
        out_shape=jax.ShapeDtypeStruct((B, T, HC), jnp.bfloat16),
        grid_spec=pltpu.PrefetchScalarGridSpec(
            num_scalar_prefetch=0,
            grid=(B, H // hpb, T // t_blk),
            in_specs=[mask_spec, rk_spec] + [data_spec] * 6,
            out_specs=data_spec,
            scratch_shapes=[pltpu.VMEM((hpb, N, N), jnp.float32)],
        ),
        compiler_params=pltpu.CompilerParams(
            dimension_semantics=("parallel", "parallel", "arbitrary"),
            vmem_limit_bytes=32 * 1024 * 1024),
    )(mask3, rk3, wt, qt, kt, vt, at, bt)
    return y


def rwkv7_ref(r, w, k, v, a, b, head_size, mask=None):
    """Sequential pure-JAX reference of the WKV7 forward (testing only)."""
    B, T, HC = w.shape
    N = head_size
    H = HC // N

    def prep(x):   # mirror the kernel's bf16 input rounding for the streams
        return x.astype(jnp.bfloat16).astype(jnp.float32).reshape(B, T, H, N)

    r_, k_, v_, a_, b_ = map(prep, (r, k, v, a, b))
    w_ = w.astype(jnp.float32).reshape(B, T, H, N)        # kernel keeps w in f32
    if mask is not None:
        m = jnp.asarray(mask, jnp.float32).reshape(B, T, 1, 1)
        r_, k_, v_, a_, b_ = (x * m for x in (r_, k_, v_, a_, b_))
    decay = jnp.exp(-jnp.exp(w_))

    hi = jax.lax.Precision.HIGHEST

    def step(S, xs):
        qt, kt, vt, at, bt, wt = xs
        u = jnp.einsum('bhvk,bhk->bhv', S, at, precision=hi)
        S = (S * wt[:, :, None, :]
             + jnp.einsum('bhv,bhk->bhvk', vt, kt, precision=hi)
             + jnp.einsum('bhv,bhk->bhvk', u, bt, precision=hi))
        y = jnp.einsum('bhvk,bhk->bhv', S, qt, precision=hi)
        return S, y

    xs = tuple(jnp.moveaxis(x, 1, 0) for x in (r_, k_, v_, a_, b_, decay))
    S0 = jnp.zeros((B, H, N, N), jnp.float32)
    _, ys = lax.scan(step, S0, xs)
    return jnp.moveaxis(ys, 0, 1).reshape(B, T, HC)


# ----------------------------------------------------------------------------
# RWKV_Tmix_x070_Mose forward (glue in plain JAX, hot paths in Pallas)
# ----------------------------------------------------------------------------
def init_params(key, C, head_size, n_layer, layer_id):
    H = C // head_size

    def lora_dim(f, p=0.5):
        return max(32, int(round(f * C ** p / 32) * 32))

    D_DECAY = lora_dim(1.8)
    D_AAA = lora_dim(1.8)
    D_MV = lora_dim(1.3)
    D_GATE = max(32, int(round(0.6 * C ** 0.8 / 32) * 32))

    ks = jax.random.split(key, 16)

    def nrm(k, shape, s):
        return s * jax.random.normal(k, shape, jnp.float32)

    ratio_0_to_1 = layer_id / (n_layer - 1)
    n = jnp.arange(C, dtype=jnp.float32)
    decay_speed = -7.0 + 5.0 * (n / (C - 1)) ** (0.85 + 1.0 * ratio_0_to_1 ** 0.5)

    scale = 1.0 / math.sqrt(C)
    Wr = nrm(ks[9], (C, C), scale)    # stored (in, out): y = x @ W
    Wk = nrm(ks[10], (C, C), scale)
    Wv = nrm(ks[11], (C, C), scale)

    p = {
        "w1": nrm(ks[0], (C, D_DECAY), 0.05),
        "w2": nrm(ks[1], (D_DECAY, C), 0.05),
        "w0": (decay_speed + 0.5).reshape(1, 1, C),
        "a1": nrm(ks[2], (C, D_AAA), 0.05),
        "a2": nrm(ks[3], (D_AAA, C), 0.05),
        "a0": jnp.zeros((1, 1, C), jnp.float32),
        "v1": nrm(ks[4], (C, D_MV), 0.05),
        "v2": nrm(ks[5], (D_MV, C), 0.05),
        "v0": jnp.ones((1, 1, C), jnp.float32),
        "g1": nrm(ks[6], (C, D_GATE), 0.05),
        "g2": nrm(ks[7], (D_GATE, C), 0.05),
        "k_k": 0.85 * jnp.ones((1, 1, C), jnp.float32),
        "k_a": jnp.ones((1, 1, C), jnp.float32),
        "r_k": nrm(ks[8], (H, head_size), 0.1),
        "Wrkv": jnp.concatenate([Wr, Wk, Wv], axis=1),   # fused (C, 3C) r|k|v weight
        "Wo": nrm(ks[12], (C, C), scale),
    }
    return p


def rwkv_tmix_forward(p, x, v_first, attention_mask, layer_id, head_size):
    B, T, C = x.shape
    H = C // head_size
    x2 = x.reshape(B * T, C)

    # fused r|k|v projection — one Pallas matmul (bf16 MXU, f32 acc, bf16 out)
    rkv = pallas_matmul(x2, p["Wrkv"], out_dtype=jnp.bfloat16).reshape(B, T, 3 * C)
    r = rkv[..., :C]
    k = rkv[..., C:2 * C]
    v = rkv[..., 2 * C:]

    # LoRA branches (small, f32 glue)
    w = -jax.nn.softplus(-(p["w0"] + jnp.tanh(x @ p["w1"]) @ p["w2"])) - 0.6

    if layer_id == 0:
        v_first = v.astype(x.dtype)
        v = v_first
    else:
        v = v + (v_first - v) * jax.nn.sigmoid(p["v0"] + (x @ p["v1"]) @ p["v2"])

    a = jax.nn.sigmoid(p["a0"] + (x @ p["a1"]) @ p["a2"])
    g = jax.nn.sigmoid(x @ p["g1"]) @ p["g2"]

    kk = k * p["k_k"]
    kk4 = kk.reshape(B, T, H, head_size)
    nrm = jnp.sqrt(jnp.sum(kk4 * kk4, axis=-1, keepdims=True))
    kk = (kk4 / jnp.maximum(nrm, 1e-12)).reshape(B, T, C)   # F.normalize(dim=-1)

    k = k * (1.0 + (a - 1.0) * p["k_a"])

    # WKV7 chunked recurrence + fused (r*k*r_k)-bonus — one Pallas kernel
    y = rwkv7_attention(r, w, k, v, -kk, kk * a, head_size,
                        mask=attention_mask, r_k=p["r_k"]).astype(jnp.float32)

    out = pallas_matmul((y * g).reshape(B * T, C), p["Wo"]).reshape(B, T, C)
    return out, v_first


if __name__ == "__main__":
    B, T, C = 2, 32, 128
    HEAD_SIZE = 64
    H = C // HEAD_SIZE
    N_LAYER, LAYER_ID = 4, 1

    key = jax.random.PRNGKey(0)
    kp, kx, kv = jax.random.split(key, 3)

    params = init_params(kp, C, HEAD_SIZE, N_LAYER, LAYER_ID)
    x = 0.5 * jax.random.normal(kx, (B, T, C), jnp.float32)
    v_first = 0.5 * jax.random.normal(kv, (B, T, C), jnp.float32)
    attention_mask = jnp.ones((B, T), jnp.float32)

    out, v_first_out = rwkv_tmix_forward(params, x, v_first, attention_mask,
                                         LAYER_ID, HEAD_SIZE)
    out = jax.block_until_ready(out)
    v_first_out = jax.block_until_ready(v_first_out)

    assert out.shape == (B, T, C) and v_first_out.shape == (B, T, C)
    assert bool(jnp.all(jnp.isfinite(out)))

    # sanity-check the WKV7 Pallas kernel against a sequential pure-JAX recurrence,
    # long enough to exercise multiple chunks per block AND the sequential grid
    # time axis (state carried in VMEM scratch across grid steps).
    Bk, Tk = 2, 768
    kq, kw, kk_, kv2, ka = jax.random.split(jax.random.PRNGKey(1), 5)
    r_t = 0.5 * jax.random.normal(kq, (Bk, Tk, C), jnp.float32)
    w_t = -0.6 - jax.nn.softplus(jax.random.normal(kw, (Bk, Tk, C), jnp.float32))
    k_t = 0.5 * jax.random.normal(kk_, (Bk, Tk, C), jnp.float32)
    v_t = 0.5 * jax.random.normal(kv2, (Bk, Tk, C), jnp.float32)
    kk_t = 0.5 * jax.random.normal(ka, (Bk, Tk, H, HEAD_SIZE), jnp.float32)
    kk_t = kk_t / jnp.maximum(
        jnp.sqrt(jnp.sum(kk_t * kk_t, axis=-1, keepdims=True)), 1e-12)
    kk_t = kk_t.reshape(Bk, Tk, C)
    a_sig = jax.nn.sigmoid(jax.random.normal(jax.random.PRNGKey(2), (Bk, Tk, C)))
    mask_k = jnp.ones((Bk, Tk), jnp.float32)

    y_pal = rwkv7_attention(r_t, w_t, k_t, v_t, -kk_t, kk_t * a_sig, HEAD_SIZE,
                            mask=mask_k).astype(jnp.float32)
    y_ref = rwkv7_ref(r_t, w_t, k_t, v_t, -kk_t, kk_t * a_sig, HEAD_SIZE,
                      mask=mask_k)
    y_pal = jax.block_until_ready(y_pal)
    err = float(jnp.max(jnp.abs(y_pal - y_ref)))
    scale = float(jnp.max(jnp.abs(y_ref))) + 1e-6
    assert err / scale < 5e-2, f"WKV7 mismatch: err={err}, scale={scale}"

    print("KERNEL_OK")
</pallas_src>

<mosaic_0001>
module attributes {stable_mosaic.version = 11 : i64} {
  func.func @_matmul_kernel(%arg0: i32, %arg1: i32, %arg2: i32, %arg3: memref<128x128xbf16, #tpu.memory_space<vmem>>, %arg4: memref<128x128xbf16, #tpu.memory_space<vmem>>, %arg5: memref<128x128xbf16, #tpu.memory_space<vmem>>, %arg6: memref<128x128xf32, #tpu.memory_space<vmem>>) attributes {dimension_semantics = [#tpu.dimension_semantics<parallel>, #tpu.dimension_semantics<parallel>, #tpu.dimension_semantics<arbitrary>], iteration_bounds = array<i64: 1, 3, 1>, scalar_prefetch = 0 : i64, scratch_operands = 1 : i64, tpu.core_type = #tpu.core_type<tc>, window_params = [{transform_indices = @transform_0, window_bounds = array<i64: 128, 128>}, {transform_indices = @transform_1, window_bounds = array<i64: 128, 128>}, {transform_indices = @transform_2, window_bounds = array<i64: 128, 128>}]} {
    %c0_i32 = arith.constant 0 : i32
    %0 = arith.cmpi eq, %arg2, %c0_i32 : i32
    %1 = arith.extui %0 : i1 to i32
    %c0_i32_0 = arith.constant 0 : i32
    %2 = arith.cmpi ne, %1, %c0_i32_0 : i32
    scf.if %2 {
      %cst_10 = arith.constant 0.000000e+00 : f32
      %12 = vector.broadcast %cst_10 : f32 to vector<128x128xf32>
      %c0_11 = arith.constant 0 : index
      %c0_12 = arith.constant 0 : index
      %13 = vector.load %arg6[%c0_11, %c0_12] : memref<128x128xf32, #tpu.memory_space<vmem>>, vector<128x128xf32>
      tpu.vector_store %arg6[%c0_11, %c0_12], %12 {strides = array<i32>} : memref<128x128xf32, #tpu.memory_space<vmem>>, vector<128x128xf32>,
    } else {
    }
    %c0 = arith.constant 0 : index
    %c0_1 = arith.constant 0 : index
    %3 = vector.load %arg6[%c0, %c0_1] : memref<128x128xf32, #tpu.memory_space<vmem>>, vector<128x128xf32>
    %c0_2 = arith.constant 0 : index
    %c0_3 = arith.constant 0 : index
    %4 = vector.load %arg3[%c0_2, %c0_3] : memref<128x128xbf16, #tpu.memory_space<vmem>>, vector<128x128xbf16>
    %c0_4 = arith.constant 0 : index
    %c0_5 = arith.constant 0 : index
    %5 = vector.load %arg4[%c0_4, %c0_5] : memref<128x128xbf16, #tpu.memory_space<vmem>>, vector<128x128xbf16>
    %cst = arith.constant dense<0.000000e+00> : vector<128x128xf32>
    %6 = tpu.matmul %4, %5, %cst {dimension_numbers = #tpu.dot_dimension_numbers<[1], [0], [0], [1], [0, 0, 1, 1], [], []>} : vector<128x128xbf16>, vector<128x128xbf16>, vector<128x128xf32> -> vector<128x128xf32>
    %7 = arith.addf %3, %6 : vector<128x128xf32>
    %c0_6 = arith.constant 0 : index
    %c0_7 = arith.constant 0 : index
    %8 = vector.load %arg6[%c0_6, %c0_7] : memref<128x128xf32, #tpu.memory_space<vmem>>, vector<128x128xf32>
    tpu.vector_store %arg6[%c0_6, %c0_7], %7 {strides = array<i32>} : memref<128x128xf32, #tpu.memory_space<vmem>>, vector<128x128xf32>,
    %c0_i32_8 = arith.constant 0 : i32
    %9 = arith.cmpi eq, %arg2, %c0_i32_8 : i32
    %10 = arith.extui %9 : i1 to i32
    %c0_i32_9 = arith.constant 0 : i32
    %11 = arith.cmpi ne, %10, %c0_i32_9 : i32
    scf.if %11 {
      %c0_10 = arith.constant 0 : index
      %c0_11 = arith.constant 0 : index
      %12 = vector.load %arg6[%c0_10, %c0_11] : memref<128x128xf32, #tpu.memory_space<vmem>>, vector<128x128xf32>
      %13 = arith.truncf %12 : vector<128x128xf32> to vector<128x128xbf16>
      %c0_12 = arith.constant 0 : index
      %c0_13 = arith.constant 0 : index
      %14 = vector.load %arg5[%c0_12, %c0_13] : memref<128x128xbf16, #tpu.memory_space<vmem>>, vector<128x128xbf16>
      tpu.vector_store %arg5[%c0_12, %c0_13], %13 {strides = array<i32>} : memref<128x128xbf16, #tpu.memory_space<vmem>>, vector<128x128xbf16>,
    } else {
    }
    return
  }
  func.func @transform_0(%arg0: i32, %arg1: i32, %arg2: i32) -> (i32, i32) {
    %c0_i32 = arith.constant 0 : i32
    return %arg0, %arg2 : i32, i32
  }
  func.func @transform_1(%arg0: i32, %arg1: i32, %arg2: i32) -> (i32, i32) {
    %c0_i32 = arith.constant 0 : i32
    return %arg2, %arg1 : i32, i32
  }
  func.func @transform_2(%arg0: i32, %arg1: i32, %arg2: i32) -> (i32, i32) {
    %c0_i32 = arith.constant 0 : i32
    return %arg0, %arg1 : i32, i32
  }
}

</mosaic_0001>

<bundles_post_ra>
// kernel: tpu_custom_call.1
= control target key start
LH: loop header
LB: loop body
LE: loop exit
PB: predicated region body
PF: predicated region fallthrough
CT: control target
= control target key end

     0   :  { %7 = vsyncpa [#allocation4], 0  ;;  %s1354_s0 = inlined_call_operand.hbm [shape: bf16[128,128], index: 0, kind: input, shape index: {}]   ;;  %s1355_s1 = inlined_call_operand.hbm [shape: bf16[128,384], index: 1, kind: input, shape index: {}]   ;;  %s1356_s2 = inlined_call_operand.hbm [shape: bf16[128,384], index: 2, kind: output, shape index: {}]  }
   0x1   :  { %8 = vsyncpa [#allocation7], 0 }
   0x2   :  { %10 = vsyncpa [#allocation7 + $0x1], 0 }
   0x3   :  { %11 = vsyncpa [#allocation5], 0 }
   0x4   :  { %13 = vsyncpa [#allocation5 + $0x1], 0  ;;  %s1162_s9 = smov 0   ;;  %s1164_s10 = smov 0  }
   0x5   :  { %s1166_s11 = smov 0   ;;  %s1168_s12 = smov 0  }
   0x6   :  { %s1170_s13 = smov 0   ;;  %s1172_s14 = smov 0  }
   0x7 LB: > { %s729_s15 = sadd.s32 4294967295, %s1136_s14   ;;  %s730_s16 = sadd.s32 4294967294, %s1136_s14   ;;  %s1136_s14 = sphi %s1172_s14, %s19_s14   ;;  %s1132_s13 = sphi %s1170_s13, %s1379_s13   ;;  %s1128_s12 = sphi %s1168_s12, %s1378_s12   ;;  %s1124_s11 = sphi %s1166_s11, %s1377_s11   ;;  %s1120_s10 = sphi %s1164_s10, %s1376_s10   ;;  %s1116_s9 = sphi %s1162_s9, %s1375_s9  }
   0x8   : > { %p82_p0 = scmp.ne.s32.totalorder %s1124_s11, %s1120_s10  ;;  %p83_p1 = scmp.eq.s32.totalorder %s1136_s14, 0 }
   0x9   : > { %p88_p2 = scmp.ne.s32.totalorder %s1120_s10, %s1116_s9  ;;  %p1199_p3 = scmp.eq.s32.totalorder %s729_s15, 0 }
   0xa   : > { %p1203_p4 = por %p83_p1, %p82_p0  ;;  %p114_p5 = scmp.eq.s32.totalorder %s729_s15, 2 }
   0xb   : > { %p1209_p6 = por %p1199_p3, %p88_p2  ;;  %p120_p7 = scmp.eq.s32.totalorder %s730_s16, 2 }
   0xc   : > { %p1213_p8 = por %p114_p5, %p82_p0  ;;  %p731_p9 = scmp.ge.s32.totalorder %s1136_s14, 1 }
   0xd   : > { %s1363_s19 = scalar_select %p1209_p6, 1, 0 }
   0xe   : > { %s1364_s20 = scalar_select %p1213_p8, 1, 0 }
   0xf   : > { %p1218_p10 = por %p120_p7, %p88_p2  ;;  %p127_p11 = scmp.lt.s32.totalorder %s1136_s14, 4 }
  0x10   : > { %s1138_s23 = smov [#allocation3]   ;;  %p924_p0 = scmp.lt.s32.totalorder %s1136_s14, 3 }
  0x11   : > { %s1365_s21 = scalar_select %p1218_p10, 1, 0 }
  0x12   : > { %p1223_p12 = pnand %p731_p9, %p127_p11  ;;  %s143_s24 = sshll.u32 %s1138_s23, 4  ;;  %s144_s24 = int_to_ptr.vmem [resolvable:$true] %s143_s24 }
  0x13   : > { %1366 = sst [smem:[#allocation12_spill]] %s1365_s21  ;;  %p1238_p2 = pnand %p924_p0, %p1203_p4 }
  0x14   : > { %p911_p13 = pneg %p1223_p12  ;;  %s34_s27 = sadd.s32 1, %s1132_s13 }
  0x15   : > { %s1009_s28 = scalar_lea.vmem %s144_s24, 1024  ;;  %p1017_p10 = scmp.lt.s32.totalorder %s144_s24, %s144_s24 }
  0x16   : > { %p1232_p1 = pnand %p911_p13, %p1199_p3  ;;  %p1010_p7 = scmp.ne.s32.totalorder %s144_s24, %s1009_s28 }
  0x17   : > { %p1018_p8 = scmp.lt.s32.totalorder %s1009_s28, %s1009_s28 }
  0x18   : > { %p1000_p5 = pneg %p1232_p1 }
  0x19   : > { %p1019_p6 = por %p1018_p8, %p1017_p10 }
  0x1a   : > { %p1012_p9 = pnand %p1010_p7, %p1000_p5 }
  0x1c   : > { %p1013_p11 = pneg %p1012_p9 }
  0x1e   : > { %p1020_p13 = pnand %p1019_p6, %p1013_p11 }
  0x20   : > { %1023 = shalt.err (!%p1020_p13)
}
  0x21   : > { %s1360_s29 = smov 64   ;;  %s1140_s30 = smov 4  }
  0x22   : > { %914 = dma.hbm_to_vmem [thread:$0]  (!%p1232_p1), %s1354_s0, 1024, %s144_s24, [#allocation4], %s1360_s29, %s1360_s29, %s1140_s30  }
  0x23   : > { %p36_p4 = scmp.ge.s32.totalorder %s34_s27, 3  ;;  %s75_s5 = sadd.s32 1, %s1124_s11 }
  0x24   : > { %s157_s6 = sand.u32 1, %s1124_s11   ;;  %s735_s15 = sshll.u32 %s1132_s13, 6 }
  0x25   : > { %s1381_s27 = smov (%p36_p4, %s34_s27), 0  ;;  %s734_s7 = sshll.u32 %s157_s6, 6 }
  0x26   : > { %s71_s8 = ssub.s32 %s1132_s13, %s1381_s27  ;;  %s169_s23 = scalar_lea.hbm %s1355_s1, %s735_s15 }
  0x27   : > { %p73_p6 = scmp.eq.s32.totalorder %s71_s8, 0  ;;  %s161_s25 = scalar_lea.vmem [#allocation6], %s734_s7 }
  0x28   : > { %s170_s28 = sshll.u32 %s161_s25, 4  ;;  %s158_s24 = scalar_lea.sflag [#allocation7], %s157_s6  ;;  %s171_s28 = int_to_ptr.vmem [resolvable:$true] %s170_s28 }
  0x29   : > { %s1264_s21 = scalar_select %p73_p6, %s1124_s11, %s75_s5  }
  0x2a   : > { %p1026_p8 = pneg %p1238_p2  ;;  %s1037_s3 = scalar_lea.vmem %s171_s28, 1024 }
  0x2b   : > { %p1038_p10 = scmp.ne.s32.totalorder %s171_s28, %s1037_s3  ;;  %s1141_s4 = smov [#allocation6]  }
  0x2c   : > { %s1042_s29 = sshll.u32 %s1141_s4, 4  ;;  %s1043_s29 = int_to_ptr.vmem [resolvable:$false] %s1042_s29 }
  0x2d   : > { %p1040_p0 = pnand %p1038_p10, %p1026_p8  ;;  %s1044_s8 = scalar_lea.vmem %s1043_s29, 2048 }
  0x2e   : > { %p1045_p5 = scmp.lt.s32.totalorder %s171_s28, %s1043_s29  ;;  %p1046_p7 = scmp.lt.s32.totalorder %s1044_s8, %s1037_s3 }
  0x2f   : > { %p1041_p1 = pneg %p1040_p0 }
  0x30   : > { %p1047_p9 = por %p1046_p7, %p1045_p5 }
  0x32   : > { %p1048_p11 = pnand %p1047_p9, %p1041_p1 }
  0x34   : > { %1051 = shalt.err (!%p1048_p11)
}
  0x35   : > { %s1142_s7 = smov 192   ;;  %s1370_s5 = smov 64  }
  0x36   : > { %918 = dma.hbm_to_vmem [thread:$0]  (!%p1238_p2), %s169_s23, 1024, %s171_s28, %s158_s24, %s1142_s7, %s1370_s5, %s1140_s30  }
  0x37   : > { %182 = sbr.rel (%p1223_p12) target bundleno = 322 (0x142), region = 28 }
  0x3c   : > { %1103 = dma.done.wait (%p1199_p3), [#allocation4], 1024  }
  0x3d   : > { %1105 = vsyncadd (%p1199_p3), [#allocation4], 4294966272  ;;  %s1279_s29 = sand.u32 1, %s1120_s10   ;;  %p1371_p2 = scmp.ne.s32.totalorder %s1363_s19, 0 }
  0x3e   : > { %s738_s26 = sshll.u32 %s1279_s29, 6  ;;  %s189_s6 = scalar_lea.sflag [#allocation7], %s1279_s29 }
  0x3f   : > { %s1285_s30 = scalar_lea.vmem [#allocation6], %s738_s26 }
  0x40   : > { %1107 = dma.done.wait (%p1371_p2), %s189_s6, 1024  }
  0x41   : > { %1109 = vsyncadd (%p1371_p2), %s189_s6, 4294966272  ;;  %v982_v0 = vld [vmem:[%s1285_s30 + $0x38] sm:$0xff]   ;;  %v983_v1 = vld [vmem:[%s1285_s30 + $0x30] sm:$0xff]   ;;  %s212_s17 = scalar_lea.vmem [#allocation8], %s738_s26  ;;  %s773_s22 = sshll.u32 %s1128_s12, 6 }
  0x42   : > { %855 = vmatprep.subr.bf16.mxu0 %v982_v0  ;;  %887 = vmatprep.subr.bf16.mxu1 %v982_v0  ;;  %v984_v2 = vld [vmem:[%s1285_s30 + $0x28] sm:$0xff]   ;;  %v985_v3 = vld [vmem:[%s1285_s30 + $0x20] sm:$0xff]   ;;  %v986_v6 = vld [vmem:[%s1285_s30 + $0x18] sm:$0xff]   ;;  %s625_s19 = sshll.u32 %s212_s17, 4  ;;  %s1307_s18 = scalar_lea.hbm %s1356_s2, %s773_s22  ;;  %s1302_s19 = int_to_ptr.vmem [resolvable:$true] %s625_s19 }
  0x43   : > { %856 = vmatpush3.bf16.msra.mxu0 %v982_v0  ;;  %895 = vmatpush3.bf16.msra.mxu1 %v982_v0  ;;  %v990_v4 = vld [vmem:[#allocation3] sm:$0xff]   ;;  %v987_v7 = vld [vmem:[%s1285_s30 + $0x10] sm:$0xff]   ;;  %v988_v8 = vld [vmem:[%s1285_s30 + $0x8] sm:$0xff]   ;;  %s610_s12 = scalar_lea.sflag [#allocation5], %s1279_s29  ;;  %s1052_s23 = scalar_lea.vmem %s1302_s19, 1024 }
  0x44   : > { %857 = vmatprep.subr.bf16.mxu0 %v983_v1  ;;  %888 = vmatprep.subr.bf16.mxu1 %v983_v1  ;;  %v991_v5 = vld [vmem:[#allocation3 + $0x20] sm:$0xff]   ;;  %v992_v10 = vld [vmem:[#allocation3 + $0x8] sm:$0xff]   ;;  %v994_v12 = vld [vmem:[#allocation3 + $0x10] sm:$0xff]   ;;  %p1053_p3 = scmp.ne.s32.totalorder %s1302_s19, %s1052_s23  ;;  %p1372_p12 = scmp.ne.s32.totalorder %s1364_s20, 0 }
  0x45   : > { %871 = vmatprep.mubr.bf16.mxu0 %v990_v4  ;;  %879 = vmatprep.mubr.bf16.mxu1 %v991_v5  ;;  %v989_v9 = vld [vmem:[%s1285_s30] sm:$0xff]   ;;  %v993_v11 = vld [vmem:[#allocation3 + $0x28] sm:$0xff]   ;;  %v995_v13 = vld [vmem:[#allocation3 + $0x30] sm:$0xff]   ;;  %s1143_s25 = smov [#allocation8]  }
  0x46   : > { %v996_v14 = vld [vmem:[#allocation3 + $0x18] sm:$0xff]   ;;  %p1054_p13 = pnand %p1053_p3, %p1372_p12  ;;  %s1056_s28 = sshll.u32 %s1143_s25, 4  ;;  %s1057_s28 = int_to_ptr.vmem [resolvable:$false] %s1056_s28 }
  0x47   : > { %858 = vmatpush3.bf16.msra.mxu0 %v983_v1  ;;  %896 = vmatpush3.bf16.msra.mxu1 %v983_v1  ;;  %v997_v15 = vld [vmem:[#allocation3 + $0x38] sm:$0xff]   ;;  %s1058_s24 = scalar_lea.vmem %s1057_s28, 2048  ;;  %p1059_p6 = scmp.lt.s32.totalorder %s1302_s19, %s1057_s28 }
  0x48   : > { %859 = vmatprep.subr.bf16.mxu0 %v984_v2  ;;  %889 = vmatprep.subr.bf16.mxu1 %v984_v2  ;;  %p1055_p4 = pneg %p1054_p13  ;;  %p1060_p8 = scmp.lt.s32.totalorder %s1058_s24, %s1052_s23 }
  0x4a   : > { %p1061_p10 = por %p1060_p8, %p1059_p6 }
  0x4b   : > { %860 = vmatpush3.bf16.msra.mxu0 %v984_v2  ;;  %897 = vmatpush3.bf16.msra.mxu1 %v984_v2 }
  0x4c   : > { %861 = vmatprep.subr.bf16.mxu0 %v985_v3  ;;  %890 = vmatprep.subr.bf16.mxu1 %v985_v3  ;;  %p1062_p0 = pnand %p1061_p10, %p1055_p4 }
  0x4f   : > { %862 = vmatpush3.bf16.msra.mxu0 %v985_v3  ;;  %898 = vmatpush3.bf16.msra.mxu1 %v985_v3 }
  0x50   : > { %863 = vmatprep.subr.bf16.mxu0 %v986_v6  ;;  %891 = vmatprep.subr.bf16.mxu1 %v986_v6 }
  0x53   : > { %864 = vmatpush3.bf16.msra.mxu0 %v986_v6  ;;  %899 = vmatpush3.bf16.msra.mxu1 %v986_v6 }
  0x54   : > { %865 = vmatprep.subr.bf16.mxu0 %v987_v7  ;;  %892 = vmatprep.subr.bf16.mxu1 %v987_v7 }
  0x57   : > { %866 = vmatpush3.bf16.msra.mxu0 %v987_v7  ;;  %900 = vmatpush3.bf16.msra.mxu1 %v987_v7 }
  0x58   : > { %867 = vmatprep.subr.bf16.mxu0 %v988_v8  ;;  %893 = vmatprep.subr.bf16.mxu1 %v988_v8 }
  0x5b   : > { %868 = vmatpush3.bf16.msra.mxu0 %v988_v8  ;;  %901 = vmatpush3.bf16.msra.mxu1 %v988_v8 }
  0x5c   : > { %869 = vmatprep.subr.bf16.mxu0 %v989_v9  ;;  %894 = vmatprep.subr.bf16.mxu1 %v989_v9 }
  0x5f   : > { %870 = vmatpush3.bf16.msra.mxu0 %v989_v9  ;;  %902 = vmatpush3.bf16.msra.mxu1 %v989_v9 }
  0x62   : > { %872 = vmatmul.mubr.bf16.vlgmr.msra.gmra.mxu0 %v992_v10  ;;  %880 = vmatmul.mubr.bf16.vlgmr.msra.gmra.mxu1 %v993_v11 }
  0x63   : > { %875 = vmatprep.mubr.bf16.mxu0 %v994_v12  ;;  %883 = vmatprep.mubr.bf16.mxu1 %v995_v13 }
  0x6a   : > { %876 = vmatmul.mubr.bf16.gmra.mxu0 %v996_v14  ;;  %884 = vmatmul.mubr.bf16.gmra.mxu1 %v997_v15 }
 0x122   : > { %v873_v16 = vpop.f32.mrf.mxu0  ;;  %v881_v17 = vpop.f32.mrf.mxu1 }
 0x124   : > { %v415_v18 = vpop.f32.mrf.mxu0  ;;  %v447_v19 = vpop.f32.mrf.mxu1 }
 0x126   : > { %v874_v20 = vpop.f32.mrf.mxu0  ;;  %v882_v21 = vpop.f32.mrf.mxu1 }
 0x127   : > { %v800_v22 = vpack.c.bf16 %v874_v20, %v873_v16  ;;  %v820_v23 = vpack.c.bf16 %v882_v21, %v881_v17 }
 0x128   : > { %v418_v24 = vpop.f32.mrf.mxu0  ;;  %v450_v25 = vpop.f32.mrf.mxu1 }
 0x129   : > { %832 = vst [vmem:[%s212_s17 + $0x8] sm:$0xff] %v800_v22   ;;  %836 = vst [vmem:[%s212_s17 + $0x28] sm:$0xff] %v820_v23   ;;  %v795_v26 = vpack.c.bf16 %v418_v24, %v415_v18  ;;  %v815_v27 = vpack.c.bf16 %v450_v25, %v447_v19 }
 0x12a   : > { %v877_v28 = vpop.f32.mrf.mxu0  ;;  %v885_v29 = vpop.f32.mrf.mxu1 }
 0x12b   : > { %796 = vst [vmem:[%s212_s17] sm:$0xff] %v795_v26   ;;  %835 = vst [vmem:[%s212_s17 + $0x20] sm:$0xff] %v815_v27  }
 0x12c   : > { %v431_v30 = vpop.f32.mrf.mxu0  ;;  %v463_v31 = vpop.f32.mrf.mxu1 }
 0x12e   : > { %v878_v32 = vpop.f32.mrf.mxu0  ;;  %v886_v33 = vpop.f32.mrf.mxu1 }
 0x12f   : > { %v810_v34 = vpack.c.bf16 %v878_v32, %v877_v28  ;;  %v830_v35 = vpack.c.bf16 %v886_v33, %v885_v29 }
 0x130   : > { %v434_v36 = vpop.f32.mrf.mxu0  ;;  %v466_v37 = vpop.f32.mrf.mxu1 }
 0x131   : > { %834 = vst [vmem:[%s212_s17 + $0x18] sm:$0xff] %v810_v34   ;;  %838 = vst [vmem:[%s212_s17 + $0x38] sm:$0xff] %v830_v35   ;;  %v805_v38 = vpack.c.bf16 %v434_v36, %v431_v30  ;;  %v825_v39 = vpack.c.bf16 %v466_v37, %v463_v31 }
 0x133   : > { %833 = vst [vmem:[%s212_s17 + $0x10] sm:$0xff] %v805_v38   ;;  %837 = vst [vmem:[%s212_s17 + $0x30] sm:$0xff] %v825_v39  }
 0x134   : > { %1065 = shalt.err (!%p1062_p0)
}
 0x135   : > { %s1066_s3 = scalar_lea.hbm %s1307_s18, 1024  ;;  %s1070_s7 = scalar_lea.hbm %s1356_s2, 3072 }
 0x136   : > { %p1067_p1 = scmp.ne.s32.totalorder %s1307_s18, %s1066_s3  ;;  %p1071_p9 = scmp.lt.s32.totalorder %s1307_s18, %s1356_s2 }
 0x137   : > { %p1072_p11 = scmp.lt.s32.totalorder %s1070_s7, %s1066_s3 }
 0x138   : > { %p1068_p5 = pnand %p1067_p1, %p1372_p12 }
 0x139   : > { %p1073_p2 = por %p1072_p11, %p1071_p9 }
 0x13a   : > { %p1069_p7 = pneg %p1068_p5 }
 0x13c   : > { %p1074_p3 = pnand %p1073_p2, %p1069_p7 }
 0x13e   : > { %1077 = shalt.err (!%p1074_p3)
}
 0x13f   : > { %s1144_s6 = smov 64   ;;  %s1145_s30 = smov 192  }
 0x140   : > { %s1146_s17 = smov 4  }
 0x141   : > { %909 = dma.vmem_to_hbm [thread:$0]  (%p1372_p12), %s1302_s19, 1024, %s1307_s18, %s610_s12, %s1144_s6, %s1145_s30, %s1146_s17  }
 0x142 PF: > { %s1373_s22 = sld [smem:[#allocation12_spill]]  ;;  %p926_p13 = scmp.ge.s32.totalorder %s1136_s14, 2 }
 0x143   : > { %s640_s15 = sand.u32 1, %s1116_s9  }
 0x144   : > { %s641_s16 = scalar_lea.sflag [#allocation5], %s640_s15 }
 0x148   : > { %p1374_p4 = scmp.ne.s32.totalorder %s1373_s22, 0 }
 0x14a   : > { %p920_p6 = pnand %p926_p13, %p1374_p4 }
 0x14c   : > { %p921_p8 = pneg %p920_p6 }
 0x14e   : > { %1111 = dma.done.wait (%p921_p8), %s641_s16, 1024  }
 0x14f   : > { %1113 = vsyncadd (%p921_p8), %s641_s16, 4294966272  ;;  %s19_s14 = sadd.s32 1, %s1136_s14   ;;  %s1375_s9 = smov %s1120_s10 }
 0x150   : > { %p16_p10 = scmp.ge.s32.totalorder %s19_s14, 5   ;;  %s1376_s10 = smov %s1124_s11 }
 0x151   : > { %s1377_s11 = smov %s1264_s21  ;;  %s1378_s12 = smov %s1132_s13 }
 0x152   : > { %s1379_s13 = smov %s1381_s27  ;;  %18 = sbr.rel (!%p16_p10) target bundleno = 7 (0x7), region = 87 }
 0x157   :  { %646 = vsyncpa [#allocation4], 1 }
 0x158   :  { %648 = vsyncpa [#allocation4 + $0x1], 1 }
 0x159   :  { %649 = vsyncpa [#allocation7], 1 }
 0x15a   :  { %651 = vsyncpa [#allocation7 + $0x1], 1 }
 0x15b   :  { %652 = vsyncpa [#allocation5], 1 }
 0x15c   :  { %654 = vsyncpa [#allocation5 + $0x1], 1 }

</bundles_post_ra>
